<compile_context>
chip_gen: v7x
topology: tpu7x:2x2x1
jax: 0.10.0
libtpu: 0.0.40
codegen_flags: <defaults>
</compile_context>

<pallas_src>
import functools

import jax
import jax.numpy as jnp
from jax.experimental import pallas as pl
from jax.experimental.pallas import tpu as pltpu  # noqa: F401  (imported per convention)


# ----------------------------------------------------------------------------
# Pallas kernel: lane-dense complex channel contraction (single invocation).
#   out[b, o, xy] = sum_i  a[b, i, xy] * w[i, o, xy]      (complex)
# with the frequency axis xy in lanes and re/im packed in the leading dim.
# ----------------------------------------------------------------------------
def _spectral_mul_kernel(a_ref, w_ref, o_ref):
    # a_ref: [2, B, I, XYp]  (index 0 = real, 1 = imag)
    # w_ref: [2, I, O, XYp]
    # o_ref: [2, B, O, XYp]
    ar = a_ref[0]                       # [B, I, XYp]
    ai = a_ref[1]
    wr = w_ref[0]                       # [I, O, XYp]
    wi = w_ref[1]

    B, I, XYp = ar.shape
    O = wr.shape[1]

    out_r = jnp.zeros((B, O, XYp), jnp.float32)
    out_i = jnp.zeros((B, O, XYp), jnp.float32)

    # I is tiny (4): unroll statically.  Each step is a full-vreg [B, O, XYp]
    # broadcast multiply-add on the VPU (no MXU for a K=4 contraction).
    for i in range(I):
        a_r = ar[:, i, :][:, None, :]   # [B, 1, XYp]
        a_i = ai[:, i, :][:, None, :]
        w_r = wr[i][None, :, :]         # [1, O, XYp]
        w_i = wi[i][None, :, :]
        out_r = out_r + (a_r * w_r - a_i * w_i)
        out_i = out_i + (a_i * w_r + a_r * w_i)

    o_ref[0] = out_r
    o_ref[1] = out_i


def spectral_mul_pallas(a_packed, w_packed):
    """a_packed: [2, B, I, XYp] f32, w_packed: [2, I, O, XYp] f32
    -> out_packed: [2, B, O, XYp] f32 (re at index 0, im at index 1)."""
    _, B, I, XYp = a_packed.shape
    O = w_packed.shape[2]
    return pl.pallas_call(
        _spectral_mul_kernel,
        out_shape=jax.ShapeDtypeStruct((2, B, O, XYp), jnp.float32),
    )(a_packed, w_packed)


# ----------------------------------------------------------------------------
# FourierLayer forward
# ----------------------------------------------------------------------------
def fourier_layer_forward(x, w1, w2, modes1, modes2, fft_norm=None):
    """x: [B, I, M, N] f32; w1, w2: [I, O, modes1, modes2, 2] f32.

    Reproduces the PyTorch module.  The reference allocates out_ft with the
    *input* channel count, so it is only valid when I == O.
    """
    B, I, M, N = x.shape
    O = w1.shape[1]
    assert I == O, "reference FourierLayer requires in_channels == out_channels"
    Nf = N // 2 + 1
    m12 = modes1 * modes2
    XY = 2 * m12                            # both spectral corners, stacked
    XYp = ((XY + 127) // 128) * 128         # lane-pad to a multiple of 128
    pad = XYp - XY

    # TODO(synk): rfft2 / irfft2 have no Pallas equivalent; done in plain JAX.
    x_ft = jnp.fft.rfft2(x, s=(M, N), norm=fft_norm)            # [B, I, M, Nf] complex64

    # Corner extract (low + negative-frequency corners), reshape/concat only.
    lo = x_ft[:, :, :modes1, :modes2].reshape(B, I, m12)
    hi = x_ft[:, :, M - modes1:, :modes2].reshape(B, I, m12)
    a = jnp.concatenate([lo, hi], axis=-1)                       # [B, I, XY] complex
    a_re = jnp.pad(jnp.real(a).astype(jnp.float32), ((0, 0), (0, 0), (0, pad)))
    a_im = jnp.pad(jnp.imag(a).astype(jnp.float32), ((0, 0), (0, 0), (0, pad)))
    a_packed = jnp.stack([a_re, a_im], axis=0)                   # [2, B, I, XYp]

    # Weights: [I, O, m1, m2, 2] -> packed [2, I, O, XYp]; reshape/concat only.
    w1f = w1.reshape(I, O, m12, 2)
    w2f = w2.reshape(I, O, m12, 2)
    w_re = jnp.pad(jnp.concatenate([w1f[..., 0], w2f[..., 0]], axis=-1),
                   ((0, 0), (0, 0), (0, pad)))
    w_im = jnp.pad(jnp.concatenate([w1f[..., 1], w2f[..., 1]], axis=-1),
                   ((0, 0), (0, 0), (0, pad)))
    w_packed = jnp.stack([w_re, w_im], axis=0)                   # [2, I, O, XYp]

    o_packed = spectral_mul_pallas(a_packed, w_packed)           # [2, B, O, XYp]

    o_c = (o_packed[0, ..., :XY] + 1j * o_packed[1, ..., :XY]).astype(jnp.complex64)
    lo_out = o_c[..., :m12].reshape(B, O, modes1, modes2)
    hi_out = o_c[..., m12:].reshape(B, O, modes1, modes2)

    # Scatter into the full spectrum (same overwrite order as the reference if
    # the corners ever overlap, i.e. modes1 > M/2).
    out_ft = jnp.zeros((B, I, M, Nf), dtype=jnp.complex64)
    out_ft = out_ft.at[:, :, :modes1, :modes2].set(lo_out)
    out_ft = out_ft.at[:, :, M - modes1:, :modes2].set(hi_out)

    return jnp.fft.irfft2(out_ft, s=(M, N), norm=fft_norm)       # [B, I, M, N] f32


# ----------------------------------------------------------------------------
# Pure-JAX reference for verification
# ----------------------------------------------------------------------------
def fourier_layer_reference(x, w1, w2, modes1, modes2, fft_norm=None):
    B, I, M, N = x.shape
    Nf = N // 2 + 1

    def cmm(a, w):
        # a: [B, I, x, y] complex, w: [I, O, x, y, 2] -> [B, O, x, y] complex
        wc = w[..., 0] + 1j * w[..., 1]
        return jnp.einsum('bixy,ioxy->boxy', a, wc)

    x_ft = jnp.fft.rfft2(x, s=(M, N), norm=fft_norm)
    out_ft = jnp.zeros((B, I, M, Nf), dtype=jnp.complex64)
    out_ft = out_ft.at[:, :, :modes1, :modes2].set(
        cmm(x_ft[:, :, :modes1, :modes2], w1))
    out_ft = out_ft.at[:, :, M - modes1:, :modes2].set(
        cmm(x_ft[:, :, M - modes1:, :modes2], w2))
    return jnp.fft.irfft2(out_ft, s=(M, N), norm=fft_norm)


# ----------------------------------------------------------------------------
# Main
# ----------------------------------------------------------------------------
if __name__ == "__main__":
    B, C, M, N = 2, 4, 16, 16          # in_channels == out_channels (required by ref)
    modes1, modes2 = 6, 6
    FFTnorm = None

    key = jax.random.PRNGKey(0)
    kx, k1, k2 = jax.random.split(key, 3)

    x = jax.random.normal(kx, (B, C, M, N), dtype=jnp.float32)

    # Deterministic Xavier-normal-style init with gain = 1 / (in*out),
    # matching nn.init.xavier_normal_ fan computation for this 5-D tensor.
    fan_in = C * modes1 * modes2 * 2
    fan_out = C * modes1 * modes2 * 2
    gain = 1.0 / (C * C)
    std = gain * (2.0 / (fan_in + fan_out)) ** 0.5
    wshape = (C, C, modes1, modes2, 2)
    w1 = std * jax.random.normal(k1, wshape, dtype=jnp.float32)
    w2 = std * jax.random.normal(k2, wshape, dtype=jnp.float32)

    fwd = jax.jit(functools.partial(fourier_layer_forward,
                                    modes1=modes1, modes2=modes2, fft_norm=FFTnorm))
    y = fwd(x, w1, w2)
    jax.block_until_ready(y)

    y_ref = fourier_layer_reference(x, w1, w2, modes1, modes2, FFTnorm)
    assert y.shape == (B, C, M, N)
    assert jnp.allclose(y, y_ref, atol=1e-5, rtol=1e-5), "mismatch vs JAX reference"

    print("KERNEL_OK")
</pallas_src>

<mosaic_0001>
module attributes {stable_mosaic.version = 11 : i64} {
  func.func @_spectral_mul_kernel(%arg0: memref<2x2x4x128xf32, #tpu.memory_space<vmem>>, %arg1: memref<2x4x4x128xf32, #tpu.memory_space<vmem>>, %arg2: memref<2x2x4x128xf32, #tpu.memory_space<vmem>>) attributes {dimension_semantics = [], scalar_prefetch = 0 : i64, scratch_operands = 0 : i64, tpu.core_type = #tpu.core_type<tc>} {
    %c0 = arith.constant 0 : index
    %c0_0 = arith.constant 0 : index
    %c0_1 = arith.constant 0 : index
    %c0_2 = arith.constant 0 : index
    %0 = vector.load %arg0[%c0, %c0_0, %c0_1, %c0_2] : memref<2x2x4x128xf32, #tpu.memory_space<vmem>>, vector<1x2x4x128xf32>
    %1 = vector.shape_cast %0 : vector<1x2x4x128xf32> to vector<2x4x128xf32>
    %c1 = arith.constant 1 : index
    %c0_3 = arith.constant 0 : index
    %c0_4 = arith.constant 0 : index
    %c0_5 = arith.constant 0 : index
    %2 = vector.load %arg0[%c1, %c0_3, %c0_4, %c0_5] : memref<2x2x4x128xf32, #tpu.memory_space<vmem>>, vector<1x2x4x128xf32>
    %3 = vector.shape_cast %2 : vector<1x2x4x128xf32> to vector<2x4x128xf32>
    %c0_6 = arith.constant 0 : index
    %c0_7 = arith.constant 0 : index
    %c0_8 = arith.constant 0 : index
    %c0_9 = arith.constant 0 : index
    %4 = vector.load %arg1[%c0_6, %c0_7, %c0_8, %c0_9] : memref<2x4x4x128xf32, #tpu.memory_space<vmem>>, vector<1x4x4x128xf32>
    %5 = vector.shape_cast %4 : vector<1x4x4x128xf32> to vector<4x4x128xf32>
    %c1_10 = arith.constant 1 : index
    %c0_11 = arith.constant 0 : index
    %c0_12 = arith.constant 0 : index
    %c0_13 = arith.constant 0 : index
    %6 = vector.load %arg1[%c1_10, %c0_11, %c0_12, %c0_13] : memref<2x4x4x128xf32, #tpu.memory_space<vmem>>, vector<1x4x4x128xf32>
    %7 = vector.shape_cast %6 : vector<1x4x4x128xf32> to vector<4x4x128xf32>
    %cst = arith.constant 0.000000e+00 : f32
    %8 = vector.broadcast %cst : f32 to vector<2x4x128xf32>
    %cst_14 = arith.constant 0.000000e+00 : f32
    %9 = vector.broadcast %cst_14 : f32 to vector<2x4x128xf32>
    %10 = vector.extract_strided_slice %1 {offsets = [0, 0, 0], sizes = [2, 1, 128], strides = [1, 1, 1]} : vector<2x4x128xf32> to vector<2x1x128xf32>
    %11 = vector.shape_cast %10 : vector<2x1x128xf32> to vector<2x128xf32>
    %12 = vector.shape_cast %11 : vector<2x128xf32> to vector<2x1x128xf32>
    %13 = vector.extract_strided_slice %3 {offsets = [0, 0, 0], sizes = [2, 1, 128], strides = [1, 1, 1]} : vector<2x4x128xf32> to vector<2x1x128xf32>
    %14 = vector.shape_cast %13 : vector<2x1x128xf32> to vector<2x128xf32>
    %15 = vector.shape_cast %14 : vector<2x128xf32> to vector<2x1x128xf32>
    %16 = vector.extract_strided_slice %5 {offsets = [0, 0, 0], sizes = [1, 4, 128], strides = [1, 1, 1]} : vector<4x4x128xf32> to vector<1x4x128xf32>
    %17 = vector.shape_cast %16 : vector<1x4x128xf32> to vector<4x128xf32>
    %18 = vector.shape_cast %17 : vector<4x128xf32> to vector<1x4x128xf32>
    %19 = vector.extract_strided_slice %7 {offsets = [0, 0, 0], sizes = [1, 4, 128], strides = [1, 1, 1]} : vector<4x4x128xf32> to vector<1x4x128xf32>
    %20 = vector.shape_cast %19 : vector<1x4x128xf32> to vector<4x128xf32>
    %21 = vector.shape_cast %20 : vector<4x128xf32> to vector<1x4x128xf32>
    %22 = vector.broadcast %12 : vector<2x1x128xf32> to vector<2x4x128xf32>
    %23 = vector.broadcast %18 : vector<1x4x128xf32> to vector<2x4x128xf32>
    %24 = arith.mulf %22, %23 : vector<2x4x128xf32>
    %25 = vector.broadcast %15 : vector<2x1x128xf32> to vector<2x4x128xf32>
    %26 = vector.broadcast %21 : vector<1x4x128xf32> to vector<2x4x128xf32>
    %27 = arith.mulf %25, %26 : vector<2x4x128xf32>
    %28 = arith.subf %24, %27 : vector<2x4x128xf32>
    %29 = arith.addf %8, %28 : vector<2x4x128xf32>
    %30 = vector.broadcast %15 : vector<2x1x128xf32> to vector<2x4x128xf32>
    %31 = vector.broadcast %18 : vector<1x4x128xf32> to vector<2x4x128xf32>
    %32 = arith.mulf %30, %31 : vector<2x4x128xf32>
    %33 = vector.broadcast %12 : vector<2x1x128xf32> to vector<2x4x128xf32>
    %34 = vector.broadcast %21 : vector<1x4x128xf32> to vector<2x4x128xf32>
    %35 = arith.mulf %33, %34 : vector<2x4x128xf32>
    %36 = arith.addf %32, %35 : vector<2x4x128xf32>
    %37 = arith.addf %9, %36 : vector<2x4x128xf32>
    %38 = vector.extract_strided_slice %1 {offsets = [0, 1, 0], sizes = [2, 1, 128], strides = [1, 1, 1]} : vector<2x4x128xf32> to vector<2x1x128xf32>
    %39 = vector.shape_cast %38 : vector<2x1x128xf32> to vector<2x128xf32>
    %40 = vector.shape_cast %39 : vector<2x128xf32> to vector<2x1x128xf32>
    %41 = vector.extract_strided_slice %3 {offsets = [0, 1, 0], sizes = [2, 1, 128], strides = [1, 1, 1]} : vector<2x4x128xf32> to vector<2x1x128xf32>
    %42 = vector.shape_cast %41 : vector<2x1x128xf32> to vector<2x128xf32>
    %43 = vector.shape_cast %42 : vector<2x128xf32> to vector<2x1x128xf32>
    %44 = vector.extract_strided_slice %5 {offsets = [1, 0, 0], sizes = [1, 4, 128], strides = [1, 1, 1]} : vector<4x4x128xf32> to vector<1x4x128xf32>
    %45 = vector.shape_cast %44 : vector<1x4x128xf32> to vector<4x128xf32>
    %46 = vector.shape_cast %45 : vector<4x128xf32> to vector<1x4x128xf32>
    %47 = vector.extract_strided_slice %7 {offsets = [1, 0, 0], sizes = [1, 4, 128], strides = [1, 1, 1]} : vector<4x4x128xf32> to vector<1x4x128xf32>
    %48 = vector.shape_cast %47 : vector<1x4x128xf32> to vector<4x128xf32>
    %49 = vector.shape_cast %48 : vector<4x128xf32> to vector<1x4x128xf32>
    %50 = vector.broadcast %40 : vector<2x1x128xf32> to vector<2x4x128xf32>
    %51 = vector.broadcast %46 : vector<1x4x128xf32> to vector<2x4x128xf32>
    %52 = arith.mulf %50, %51 : vector<2x4x128xf32>
    %53 = vector.broadcast %43 : vector<2x1x128xf32> to vector<2x4x128xf32>
    %54 = vector.broadcast %49 : vector<1x4x128xf32> to vector<2x4x128xf32>
    %55 = arith.mulf %53, %54 : vector<2x4x128xf32>
    %56 = arith.subf %52, %55 : vector<2x4x128xf32>
    %57 = arith.addf %29, %56 : vector<2x4x128xf32>
    %58 = vector.broadcast %43 : vector<2x1x128xf32> to vector<2x4x128xf32>
    %59 = vector.broadcast %46 : vector<1x4x128xf32> to vector<2x4x128xf32>
    %60 = arith.mulf %58, %59 : vector<2x4x128xf32>
    %61 = vector.broadcast %40 : vector<2x1x128xf32> to vector<2x4x128xf32>
    %62 = vector.broadcast %49 : vector<1x4x128xf32> to vector<2x4x128xf32>
    %63 = arith.mulf %61, %62 : vector<2x4x128xf32>
    %64 = arith.addf %60, %63 : vector<2x4x128xf32>
    %65 = arith.addf %37, %64 : vector<2x4x128xf32>
    %66 = vector.extract_strided_slice %1 {offsets = [0, 2, 0], sizes = [2, 1, 128], strides = [1, 1, 1]} : vector<2x4x128xf32> to vector<2x1x128xf32>
    %67 = vector.shape_cast %66 : vector<2x1x128xf32> to vector<2x128xf32>
    %68 = vector.shape_cast %67 : vector<2x128xf32> to vector<2x1x128xf32>
    %69 = vector.extract_strided_slice %3 {offsets = [0, 2, 0], sizes = [2, 1, 128], strides = [1, 1, 1]} : vector<2x4x128xf32> to vector<2x1x128xf32>
    %70 = vector.shape_cast %69 : vector<2x1x128xf32> to vector<2x128xf32>
    %71 = vector.shape_cast %70 : vector<2x128xf32> to vector<2x1x128xf32>
    %72 = vector.extract_strided_slice %5 {offsets = [2, 0, 0], sizes = [1, 4, 128], strides = [1, 1, 1]} : vector<4x4x128xf32> to vector<1x4x128xf32>
    %73 = vector.shape_cast %72 : vector<1x4x128xf32> to vector<4x128xf32>
    %74 = vector.shape_cast %73 : vector<4x128xf32> to vector<1x4x128xf32>
    %75 = vector.extract_strided_slice %7 {offsets = [2, 0, 0], sizes = [1, 4, 128], strides = [1, 1, 1]} : vector<4x4x128xf32> to vector<1x4x128xf32>
    %76 = vector.shape_cast %75 : vector<1x4x128xf32> to vector<4x128xf32>
    %77 = vector.shape_cast %76 : vector<4x128xf32> to vector<1x4x128xf32>
    %78 = vector.broadcast %68 : vector<2x1x128xf32> to vector<2x4x128xf32>
    %79 = vector.broadcast %74 : vector<1x4x128xf32> to vector<2x4x128xf32>
    %80 = arith.mulf %78, %79 : vector<2x4x128xf32>
    %81 = vector.broadcast %71 : vector<2x1x128xf32> to vector<2x4x128xf32>
    %82 = vector.broadcast %77 : vector<1x4x128xf32> to vector<2x4x128xf32>
    %83 = arith.mulf %81, %82 : vector<2x4x128xf32>
    %84 = arith.subf %80, %83 : vector<2x4x128xf32>
    %85 = arith.addf %57, %84 : vector<2x4x128xf32>
    %86 = vector.broadcast %71 : vector<2x1x128xf32> to vector<2x4x128xf32>
    %87 = vector.broadcast %74 : vector<1x4x128xf32> to vector<2x4x128xf32>
    %88 = arith.mulf %86, %87 : vector<2x4x128xf32>
    %89 = vector.broadcast %68 : vector<2x1x128xf32> to vector<2x4x128xf32>
    %90 = vector.broadcast %77 : vector<1x4x128xf32> to vector<2x4x128xf32>
    %91 = arith.mulf %89, %90 : vector<2x4x128xf32>
    %92 = arith.addf %88, %91 : vector<2x4x128xf32>
    %93 = arith.addf %65, %92 : vector<2x4x128xf32>
    %94 = vector.extract_strided_slice %1 {offsets = [0, 3, 0], sizes = [2, 1, 128], strides = [1, 1, 1]} : vector<2x4x128xf32> to vector<2x1x128xf32>
    %95 = vector.shape_cast %94 : vector<2x1x128xf32> to vector<2x128xf32>
    %96 = vector.shape_cast %95 : vector<2x128xf32> to vector<2x1x128xf32>
    %97 = vector.extract_strided_slice %3 {offsets = [0, 3, 0], sizes = [2, 1, 128], strides = [1, 1, 1]} : vector<2x4x128xf32> to vector<2x1x128xf32>
    %98 = vector.shape_cast %97 : vector<2x1x128xf32> to vector<2x128xf32>
    %99 = vector.shape_cast %98 : vector<2x128xf32> to vector<2x1x128xf32>
    %100 = vector.extract_strided_slice %5 {offsets = [3, 0, 0], sizes = [1, 4, 128], strides = [1, 1, 1]} : vector<4x4x128xf32> to vector<1x4x128xf32>
    %101 = vector.shape_cast %100 : vector<1x4x128xf32> to vector<4x128xf32>
    %102 = vector.shape_cast %101 : vector<4x128xf32> to vector<1x4x128xf32>
    %103 = vector.extract_strided_slice %7 {offsets = [3, 0, 0], sizes = [1, 4, 128], strides = [1, 1, 1]} : vector<4x4x128xf32> to vector<1x4x128xf32>
    %104 = vector.shape_cast %103 : vector<1x4x128xf32> to vector<4x128xf32>
    %105 = vector.shape_cast %104 : vector<4x128xf32> to vector<1x4x128xf32>
    %106 = vector.broadcast %96 : vector<2x1x128xf32> to vector<2x4x128xf32>
    %107 = vector.broadcast %102 : vector<1x4x128xf32> to vector<2x4x128xf32>
    %108 = arith.mulf %106, %107 : vector<2x4x128xf32>
    %109 = vector.broadcast %99 : vector<2x1x128xf32> to vector<2x4x128xf32>
    %110 = vector.broadcast %105 : vector<1x4x128xf32> to vector<2x4x128xf32>
    %111 = arith.mulf %109, %110 : vector<2x4x128xf32>
    %112 = arith.subf %108, %111 : vector<2x4x128xf32>
    %113 = arith.addf %85, %112 : vector<2x4x128xf32>
    %114 = vector.broadcast %99 : vector<2x1x128xf32> to vector<2x4x128xf32>
    %115 = vector.broadcast %102 : vector<1x4x128xf32> to vector<2x4x128xf32>
    %116 = arith.mulf %114, %115 : vector<2x4x128xf32>
    %117 = vector.broadcast %96 : vector<2x1x128xf32> to vector<2x4x128xf32>
    %118 = vector.broadcast %105 : vector<1x4x128xf32> to vector<2x4x128xf32>
    %119 = arith.mulf %117, %118 : vector<2x4x128xf32>
    %120 = arith.addf %116, %119 : vector<2x4x128xf32>
    %121 = arith.addf %93, %120 : vector<2x4x128xf32>
    %c0_15 = arith.constant 0 : index
    %c0_16 = arith.constant 0 : index
    %c0_17 = arith.constant 0 : index
    %c0_18 = arith.constant 0 : index
    %122 = vector.load %arg2[%c0_15, %c0_16, %c0_17, %c0_18] : memref<2x2x4x128xf32, #tpu.memory_space<vmem>>, vector<1x2x4x128xf32>
    %123 = vector.shape_cast %122 : vector<1x2x4x128xf32> to vector<2x4x128xf32>
    %124 = vector.shape_cast %113 : vector<2x4x128xf32> to vector<1x2x4x128xf32>
    tpu.vector_store %arg2[%c0_15, %c0_16, %c0_17, %c0_18], %124 {strides = array<i32>} : memref<2x2x4x128xf32, #tpu.memory_space<vmem>>, vector<1x2x4x128xf32>,
    %c1_19 = arith.constant 1 : index
    %c0_20 = arith.constant 0 : index
    %c0_21 = arith.constant 0 : index
    %c0_22 = arith.constant 0 : index
    %125 = vector.load %arg2[%c1_19, %c0_20, %c0_21, %c0_22] : memref<2x2x4x128xf32, #tpu.memory_space<vmem>>, vector<1x2x4x128xf32>
    %126 = vector.shape_cast %125 : vector<1x2x4x128xf32> to vector<2x4x128xf32>
    %127 = vector.shape_cast %121 : vector<2x4x128xf32> to vector<1x2x4x128xf32>
    tpu.vector_store %arg2[%c1_19, %c0_20, %c0_21, %c0_22], %127 {strides = array<i32>} : memref<2x2x4x128xf32, #tpu.memory_space<vmem>>, vector<1x2x4x128xf32>,
    return
  }
}

</mosaic_0001>

<bundles_post_ra>
// kernel: reverse.1
= control target key start
LH: loop header
LB: loop body
LE: loop exit
PB: predicated region body
PF: predicated region fallthrough
CT: control target
= control target key end

     0   :  { %v71_v3 = vlaneseq  ;;  %v64_v9 = vld [vmem:[#allocation0 + $0x7] ss:$-1 sm:$0xff]  ;;  %v78_v12 = vld [vmem:[#allocation0 + $0x17] ss:$-1 sm:$0xff]  ;;  %s329_s0 = inlined_call_operand.vmem [shape: f32[2,4,16,7], index: 0, kind: input, shape index: {}]   ;;  %s330_s1 = inlined_call_operand.vmem [shape: f32[2,4,16,7], index: 1, kind: output, shape index: {}]  }
   0x1   :  { %v44_v0 = vld [vmem:[%s329_s0] sm:$0xff]  ;;  %v46_v1 = vld [vmem:[%s329_s0 + $0x8] sm:$0xff]  ;;  %v48_v2 = vld [vmem:[%s329_s0 + $0x10] sm:$0xff]  ;;  %v65_v10 = vrot.slane %v64_v9, 1  ;;  %v79_v14 = vrot.slane %v78_v12, 1 }
   0x2   :  { %45 = vst [vmem:[#allocation0 + $0x8] sm:$0xff] %v44_v0  ;;  %47 = vst [vmem:[#allocation0 + $0x18] sm:$0xff] %v46_v1  ;;  %v50_v4 = vld [vmem:[%s329_s0 + $0x18] sm:$0xff]  ;;  %v52_v5 = vld [vmem:[%s329_s0 + $0x20] sm:$0xff]  ;;  %v72_v11 = vshrl.u32 %v71_v3, 7 }
   0x3   :  { %49 = vst [vmem:[#allocation0 + $0x28] sm:$0xff] %v48_v2  ;;  %v54_v6 = vld [vmem:[%s329_s0 + $0x28] sm:$0xff]  ;;  %51 = vst [vmem:[#allocation0 + $0x38] sm:$0xff] %v50_v4  ;;  %v56_v7 = vld [vmem:[%s329_s0 + $0x30] sm:$0xff] }
   0x4   :  { %53 = vst [vmem:[#allocation0 + $0x48] sm:$0xff] %v52_v5  ;;  %55 = vst [vmem:[#allocation0 + $0x58] sm:$0xff] %v54_v6  ;;  %v58_v8 = vld [vmem:[%s329_s0 + $0x38] sm:$0xff]  ;;  %v92_v13 = vld [vmem:[#allocation0 + $0x27] ss:$-1 sm:$0xff]  ;;  %vm73_vm0 = vcmp.lt.s32.totalorder %v72_v11, 7 }
   0x5   :  { %57 = vst [vmem:[#allocation0 + $0x68] sm:$0xff] %v56_v7  ;;  %59 = vst [vmem:[#allocation0 + $0x78] sm:$0xff] %v58_v8  ;;  %v93_v15 = vrot.slane %v92_v13, 1  ;;  %v106_v16 = vld [vmem:[#allocation0 + $0x37] ss:$-1 sm:$0xff] }
   0x6   :  { %66 = vst [vmem:[#allocation1] sm:$0xff] %v65_v10  ;;  %v107_v17 = vrot.slane %v106_v16, 1  ;;  %v120_v18 = vld [vmem:[#allocation0 + $0x47] ss:$-1 sm:$0xff]  ;;  %v134_v19 = vld [vmem:[#allocation0 + $0x57] ss:$-1 sm:$0xff] }
   0x7   :  { %80 = vst [vmem:[#allocation1 + $0x8] sm:$0xff] %v79_v14  ;;  %94 = vst [vmem:[#allocation1 + $0x10] sm:$0xff] %v93_v15  ;;  %v121_v20 = vrot.slane %v120_v18, 1  ;;  %v135_v21 = vrot.slane %v134_v19, 1  ;;  %v148_v22 = vld [vmem:[#allocation0 + $0x67] ss:$-1 sm:$0xff] }
   0x8   :  { %v162_v23 = vld [vmem:[#allocation0 + $0x77] ss:$-1 sm:$0xff]  ;;  %108 = vst [vmem:[#allocation1 + $0x18] sm:$0xff] %v107_v17  ;;  %v149_v24 = vrot.slane %v148_v22, 1 }
   0x9   :  { %v163_v25 = vrot.slane %v162_v23, 1  ;;  %v69_v26 = vld [vmem:[#allocation0 + $0xf] ss:$-1 sm:$0xff]  ;;  %v83_v27 = vld [vmem:[#allocation0 + $0x1f] ss:$-1 sm:$0xff]  ;;  %122 = vst [vmem:[#allocation1 + $0x20] sm:$0xff] %v121_v20 }
   0xa   :  { %v97_v28 = vld [vmem:[#allocation0 + $0x2f] ss:$-1 sm:$0xff]  ;;  %136 = vst [vmem:[#allocation1 + $0x28] sm:$0xff] %v135_v21  ;;  %v70_v29 = vrot.slane %v69_v26, 1  ;;  %v84_v30 = vrot.slane %v83_v27, 1  ;;  %150 = vst [vmem:[#allocation1 + $0x30] sm:$0xff] %v149_v24 }
   0xb   :  { %v98_v31 = vrot.slane %v97_v28, 1  ;;  %v111_v32 = vld [vmem:[#allocation0 + $0x3f] ss:$-1 sm:$0xff]  ;;  %164 = vst [vmem:[#allocation1 + $0x38] sm:$0xff] %v163_v25  ;;  %v125_v34 = vld [vmem:[#allocation0 + $0x4f] ss:$-1 sm:$0xff] }
   0xc   :  { %v112_v33 = vrot.slane %v111_v32, 1  ;;  %v139_v35 = vld [vmem:[#allocation0 + $0x5f] ss:$-1 sm:$0xff]  ;;  %74 = vst.msk [vmem:[#allocation1] sm:$0xff] %vm73_vm0, %v70_v29  ;;  %88 = vst.msk [vmem:[#allocation1 + $0x8] sm:$0xff] %vm73_vm0, %v84_v30  ;;  %v126_v36 = vrot.slane %v125_v34, 1 }
   0xd   :  { %102 = vst.msk [vmem:[#allocation1 + $0x10] sm:$0xff] %vm73_vm0, %v98_v31  ;;  %v140_v37 = vrot.slane %v139_v35, 1  ;;  %v153_v38 = vld [vmem:[#allocation0 + $0x6f] ss:$-1 sm:$0xff]  ;;  %v167_v39 = vld [vmem:[#allocation0 + $0x7f] ss:$-1 sm:$0xff] }
   0xe   :  { %116 = vst.msk [vmem:[#allocation1 + $0x18] sm:$0xff] %vm73_vm0, %v112_v33  ;;  %v154_v40 = vrot.slane %v153_v38, 1  ;;  %v168_v41 = vrot.slane %v167_v39, 1  ;;  %130 = vst.msk [vmem:[#allocation1 + $0x20] sm:$0xff] %vm73_vm0, %v126_v36 }
   0xf   :  { %144 = vst.msk [vmem:[#allocation1 + $0x28] sm:$0xff] %vm73_vm0, %v140_v37 }
  0x10   :  { %158 = vst.msk [vmem:[#allocation1 + $0x30] sm:$0xff] %vm73_vm0, %v154_v40  ;;  %172 = vst.msk [vmem:[#allocation1 + $0x38] sm:$0xff] %vm73_vm0, %v168_v41 }
  0x13   :  { %v214_v42 = vld [vmem:[#allocation1] sm:$0xff]  ;;  %v216_v43 = vld [vmem:[#allocation1 + $0x8] sm:$0xff] }
  0x14   :  { %v218_v44 = vld [vmem:[#allocation1 + $0x10] sm:$0xff]  ;;  %215 = vst [vmem:[%s330_s1] sm:$0xff] %v214_v42  ;;  %217 = vst [vmem:[%s330_s1 + $0x8] sm:$0xff] %v216_v43 }
  0x15   :  { %219 = vst [vmem:[%s330_s1 + $0x10] sm:$0xff] %v218_v44  ;;  %v220_v45 = vld [vmem:[#allocation1 + $0x18] sm:$0xff]  ;;  %v222_v46 = vld [vmem:[#allocation1 + $0x20] sm:$0xff] }
  0x16   :  { %221 = vst [vmem:[%s330_s1 + $0x18] sm:$0xff] %v220_v45  ;;  %v224_v47 = vld [vmem:[#allocation1 + $0x28] sm:$0xff]  ;;  %223 = vst [vmem:[%s330_s1 + $0x20] sm:$0xff] %v222_v46 }
  0x17   :  { %225 = vst [vmem:[%s330_s1 + $0x28] sm:$0xff] %v224_v47  ;;  %v226_v48 = vld [vmem:[#allocation1 + $0x30] sm:$0xff]  ;;  %v228_v49 = vld [vmem:[#allocation1 + $0x38] sm:$0xff] }
  0x18   :  { %227 = vst [vmem:[%s330_s1 + $0x30] sm:$0xff] %v226_v48  ;;  %229 = vst [vmem:[%s330_s1 + $0x38] sm:$0xff] %v228_v49 }

// kernel: fourier_layer_forward.1
= control target key start
LH: loop header
LB: loop body
LE: loop exit
PB: predicated region body
PF: predicated region fallthrough
CT: control target
= control target key end

     0   :  { %v25_v0 = vlaneseq  ;;  %s281_s0 = inlined_call_operand.vmem [shape: f32[2,2,4,128], index: 0, kind: input, shape index: {}]   ;;  %s282_s1 = inlined_call_operand.vmem [shape: f32[2,4,4,128], index: 1, kind: input, shape index: {}]   ;;  %s283_s2 = inlined_call_operand.vmem [shape: f32[2,2,4,128], index: 2, kind: output, shape index: {}]  }
   0x1   :  { %v11_v2 = vld [vmem:[%s281_s0] sm:$0xf]  ;;  %v162_v3 = vld [vmem:[%s281_s0 + $0x8] sm:$0xf]  ;;  %v199_v5 = vld [vmem:[%s282_s1 + $0x4] sm:$0xf] }
   0x2   :  { %v26_v1 = vshrl.u32 %v25_v0, 7  ;;  %v194_v4 = vld [vmem:[%s282_s1] sm:$0xf]  ;;  %v204_v10 = vld [vmem:[%s282_s1 + $0x8] sm:$0xf] }
   0x3   :  { %v209_v11 = vld [vmem:[%s282_s1 + $0x10] sm:$0xf]  ;;  %v214_v12 = vld [vmem:[%s282_s1 + $0x14] sm:$0xf]  ;;  %v219_v13 = vld [vmem:[%s282_s1 + $0xc] sm:$0xf] }
   0x4   :  { %v27_v6 = vsub.s32 0, %v26_v1  ;;  %v59_v7 = vsub.s32 1, %v26_v1  ;;  %v91_v8 = vsub.s32 2, %v26_v1  ;;  %v123_v9 = vsub.s32 3, %v26_v1  ;;  %v224_v14 = vld [vmem:[%s282_s1 + $0x18] sm:$0xf] }
   0x5   :  { %v229_v15 = vld [vmem:[%s282_s1 + $0x1c] sm:$0xf]  ;;  %v12_v24 = vld [vmem:[%s281_s0 + $0x4] sm:$0xf]  ;;  %v163_v25 = vld [vmem:[%s281_s0 + $0xc] sm:$0xf] }
   0x6   :  { %v28_v16 = vrot.slane %v11_v2, %v27_v6  ;;  %v38_v17 = vrot.slane %v162_v3, %v27_v6  ;;  %v60_v18 = vrot.slane %v11_v2, %v59_v7  ;;  %v70_v19 = vrot.slane %v162_v3, %v59_v7 }
   0x7   :  { %v92_v20 = vrot.slane %v11_v2, %v91_v8  ;;  %v102_v21 = vrot.slane %v162_v3, %v91_v8  ;;  %v124_v22 = vrot.slane %v11_v2, %v123_v9  ;;  %v134_v23 = vrot.slane %v162_v3, %v123_v9 }
   0x8   :  { %v33_v26 = vmul.f32 %v28_v16, %v194_v4  ;;  %v43_v27 = vmul.f32 %v209_v11, %v38_v17  ;;  %v65_v28 = vmul.f32 %v60_v18, %v199_v5  ;;  %v75_v29 = vmul.f32 %v214_v12, %v70_v19 }
   0x9   :  { %v97_v30 = vmul.f32 %v92_v20, %v204_v10  ;;  %v107_v31 = vmul.f32 %v224_v14, %v102_v21  ;;  %v129_v32 = vmul.f32 %v124_v22, %v219_v13  ;;  %v139_v33 = vmul.f32 %v229_v15, %v134_v23 }
   0xa   :  { %v45_v34 = vsub.f32 %v33_v26, %v43_v27  ;;  %v77_v35 = vsub.f32 %v65_v28, %v75_v29  ;;  %v32_v36 = vrot.slane %v12_v24, %v27_v6  ;;  %v42_v37 = vrot.slane %v163_v25, %v27_v6 }
   0xb   :  { %v109_v38 = vsub.f32 %v97_v30, %v107_v31  ;;  %v141_v39 = vsub.f32 %v129_v32, %v139_v33  ;;  %v64_v40 = vrot.slane %v12_v24, %v59_v7  ;;  %v74_v41 = vrot.slane %v163_v25, %v59_v7 }
   0xc   :  { %v79_v42 = vadd.f32 %v77_v35, %v45_v34  ;;  %v34_v43 = vmul.f32 %v32_v36, %v194_v4  ;;  %v44_v44 = vmul.f32 %v209_v11, %v42_v37  ;;  %v96_v45 = vrot.slane %v12_v24, %v91_v8 }
   0xd   :  { %v66_v46 = vmul.f32 %v64_v40, %v199_v5  ;;  %v76_v47 = vmul.f32 %v214_v12, %v74_v41  ;;  %v106_v48 = vrot.slane %v163_v25, %v91_v8  ;;  %v128_v49 = vrot.slane %v12_v24, %v123_v9 }
   0xe   :  { %v111_v50 = vadd.f32 %v109_v38, %v79_v42  ;;  %v46_v51 = vsub.f32 %v34_v43, %v44_v44  ;;  %v98_v52 = vmul.f32 %v96_v45, %v204_v10  ;;  %v138_v53 = vrot.slane %v163_v25, %v123_v9 }
   0xf   :  { %v78_v54 = vsub.f32 %v66_v46, %v76_v47  ;;  %v108_v55 = vmul.f32 %v224_v14, %v106_v48  ;;  %v130_v56 = vmul.f32 %v128_v49, %v219_v13  ;;  %v49_v57 = vmul.f32 %v38_v17, %v194_v4 }
  0x10   :  { %v143_v58 = vadd.f32 %v141_v39, %v111_v50  ;;  %v140_v59 = vmul.f32 %v229_v15, %v138_v53  ;;  %v51_v60 = vmul.f32 %v209_v11, %v28_v16  ;;  %v81_v61 = vmul.f32 %v70_v19, %v199_v5 }
  0x11   :  { %v80_v62 = vadd.f32 %v78_v54, %v46_v51  ;;  %v110_v63 = vsub.f32 %v98_v52, %v108_v55  ;;  %v83_v0 = vmul.f32 %v214_v12, %v60_v18  ;;  %v113_v1 = vmul.f32 %v102_v21, %v204_v10 }
  0x12   :  { %153 = vst [vmem:[%s283_s2] sm:$0xf] %v143_v58  ;;  %v142_v2 = vsub.f32 %v130_v56, %v140_v59  ;;  %v53_v3 = vadd.f32 %v51_v60, %v49_v57  ;;  %v115_v6 = vmul.f32 %v224_v14, %v92_v20  ;;  %v145_v7 = vmul.f32 %v134_v23, %v219_v13 }
  0x13   :  { %v112_v8 = vadd.f32 %v110_v63, %v80_v62  ;;  %v85_v9 = vadd.f32 %v83_v0, %v81_v61  ;;  %v147_v16 = vmul.f32 %v229_v15, %v124_v22  ;;  %v50_v17 = vmul.f32 %v42_v37, %v194_v4 }
  0x14   :  { %v117_v19 = vadd.f32 %v115_v6, %v113_v1  ;;  %v52_v18 = vmul.f32 %v209_v11, %v32_v36  ;;  %v82_v21 = vmul.f32 %v74_v41, %v199_v5  ;;  %v84_v24 = vmul.f32 %v214_v12, %v64_v40 }
  0x15   :  { %v144_v25 = vadd.f32 %v142_v2, %v112_v8  ;;  %v87_v26 = vadd.f32 %v85_v9, %v53_v3  ;;  %v149_v27 = vadd.f32 %v147_v16, %v145_v7  ;;  %v114_v20 = vmul.f32 %v106_v48, %v204_v10 }
  0x16   :  { %v54_v28 = vadd.f32 %v52_v18, %v50_v17  ;;  %v86_v23 = vadd.f32 %v84_v24, %v82_v21  ;;  %v116_v29 = vmul.f32 %v224_v14, %v96_v45  ;;  %v146_v22 = vmul.f32 %v138_v53, %v219_v13 }
  0x17   :  { %154 = vst [vmem:[%s283_s2 + $0x4] sm:$0xf] %v144_v25  ;;  %v119_v4 = vadd.f32 %v117_v19, %v87_v26  ;;  %v148_v5 = vmul.f32 %v229_v15, %v128_v49 }
  0x18   :  { %v88_v11 = vadd.f32 %v86_v23, %v54_v28  ;;  %v118_v12 = vadd.f32 %v116_v29, %v114_v20 }
  0x19   :  { %v151_v30 = vadd.f32 %v149_v27, %v119_v4  ;;  %v150_v31 = vadd.f32 %v148_v5, %v146_v22 }
  0x1a   :  { %v120_v32 = vadd.f32 %v118_v12, %v88_v11 }
  0x1b   :  { %168 = vst [vmem:[%s283_s2 + $0x8] sm:$0xf] %v151_v30 }
  0x1c   :  { %v152_v10 = vadd.f32 %v150_v31, %v120_v32 }
  0x1e   :  { %169 = vst [vmem:[%s283_s2 + $0xc] sm:$0xf] %v152_v10 }

</bundles_post_ra>
